<compile_context>
chip_gen: v6e
topology: v6e:2x2x1
jax: 0.10.0
libtpu: 0.0.40
codegen_flags: <defaults>
</compile_context>

<pallas_src>
import jax
import jax.numpy as jnp
from jax.experimental import pallas as pl
from jax.experimental.pallas import tpu as pltpu


def _identity_copy_kernel(x_hbm_ref, o_hbm_ref, copy_sem):
    # Direct HBM -> HBM DMA: no VMEM staging, no grid, no tiling, no padding.
    cp = pltpu.make_async_copy(x_hbm_ref, o_hbm_ref, copy_sem)
    cp.start()
    cp.wait()


def base_model_forward(x: jax.Array, *, use_pallas: bool = True) -> jax.Array:
    """Identity forward for the (abstract) BaseModel, as a Pallas TPU kernel.

    x: arbitrary-shaped array (e.g. NCHW). Returns an array identical to x.
    With use_pallas=False the wrapper short-circuits entirely (fastest path).
    """
    if not use_pallas:
        return x

    # Advisory only (purely memory-bound op): one read + one write of x.
    itemsize = max(1, jnp.dtype(x.dtype).itemsize)
    bytes_accessed = 2 * x.size * itemsize

    return pl.pallas_call(
        _identity_copy_kernel,
        out_shape=jax.ShapeDtypeStruct(x.shape, x.dtype),
        in_specs=[pl.BlockSpec(memory_space=pl.ANY)],
        out_specs=pl.BlockSpec(memory_space=pl.ANY),
        scratch_shapes=[pltpu.SemaphoreType.DMA],
        cost_estimate=pl.CostEstimate(
            flops=0, transcendentals=0, bytes_accessed=int(bytes_accessed)
        ),
    )(x)


if __name__ == "__main__":
    key = jax.random.PRNGKey(0)

    # Small NCHW input consistent with a VAE/Diffusion-style model input.
    x = jax.random.normal(key, (2, 4, 16, 16), dtype=jnp.float32)
    y = jax.block_until_ready(base_model_forward(x))
    assert y.shape == x.shape and y.dtype == x.dtype
    assert bool(jnp.all(y == x))

    # Ragged, non-lane-aligned shape + bf16: no padding / slicing required.
    k2 = jax.random.PRNGKey(0)
    x2 = jax.random.normal(k2, (3, 5, 7), dtype=jnp.bfloat16)
    y2 = jax.block_until_ready(base_model_forward(x2))
    assert y2.shape == x2.shape and y2.dtype == x2.dtype
    assert bool(jnp.all(y2 == x2))

    print("KERNEL_OK")
</pallas_src>

<mosaic_0001>
module attributes {stable_mosaic.version = 11 : i64} {
  func.func @_identity_copy_kernel(%arg0: memref<2x4x16x16xf32, #tpu.memory_space<any>>, %arg1: memref<2x4x16x16xf32, #tpu.memory_space<any>>, %arg2: memref<!tpu.dma_semaphore, #tpu.memory_space<semaphore_mem>>) attributes {dimension_semantics = [], scalar_prefetch = 0 : i64, scratch_operands = 1 : i64, tpu.core_type = #tpu.core_type<tc>} {
    tpu.enqueue_dma source(%arg0 : memref<2x4x16x16xf32, #tpu.memory_space<any>>) target(%arg1 : memref<2x4x16x16xf32, #tpu.memory_space<any>>) target_semaphore(%arg2 : memref<!tpu.dma_semaphore, #tpu.memory_space<semaphore_mem>>)
    tpu.wait_dma2 semaphore(%arg2 : memref<!tpu.dma_semaphore, #tpu.memory_space<semaphore_mem>>) src(%arg0 : memref<2x4x16x16xf32, #tpu.memory_space<any>>) dst(%arg1 : memref<2x4x16x16xf32, #tpu.memory_space<any>>)
    return
  }
}

</mosaic_0001>

<bundles_post_ra>
// kernel: tpu_custom_call.1
= control target key start
LH: loop header
LB: loop body
LE: loop exit
PB: predicated region body
PF: predicated region fallthrough
CT: control target
= control target key end

     0   :  { %s30_s6 = smov [#allocation2]   ;;  %s31_s7 = smov 131072   ;;  %s49_s0 = inlined_call_operand.hbm [shape: f32[2,4,16,16], index: 0, kind: input, shape index: {}]   ;;  %s50_s1 = inlined_call_operand.hbm [shape: f32[2,4,16,16], index: 1, kind: output, shape index: {}]  }
   0x1   :  { %s32_s8 = smov 0  }
   0x2   :  { %12 = dma.general %s49_s0, 2048, %s50_s1, %s30_s6, %s31_s7, [#allocation4], %s32_s8, 0  }
   0x3   :  { %28 = dma.done.wait [#allocation2], 2048 }
   0x4   :  { %29 = vsyncadd [#allocation2], 4294965248 }
   0x5   :  { %18 = vsyncmov [#allocation2] }
   0x8   :  { %s19_s13 = vpop.sfrf %18 }
   0x9   :  { %p24_p0 = scmp.ne.s32.totalorder %s19_s13, 0 }
   0xb   :  { %23 = shalt.err (%p24_p0)  }

</bundles_post_ra>
